<compile_context>
chip_gen: v5e
topology: v5e:2x2
jax: 0.10.0
libtpu: 0.0.40
codegen_flags: <defaults>
</compile_context>

<pallas_src>
import functools

import jax
import jax.numpy as jnp
from jax.experimental import pallas as pl
from jax.experimental.pallas import tpu as pltpu


def _nerf_kernel(n_hidden,
                 pd_ref,
                 w1_ref, b1_ref, wh_ref, bh_ref, wo_ref, bo_ref,
                 rgbd_ref):
    """One lane-dense tile of rays through the full MLP + output activations.

    pd_ref: (6, TN) f32 (rows 0..2 = pos, rows 3..5 = dir),
    hidden h: (H, TN) f32, rgbd_ref: (4, TN) f32.
    """
    pd = pd_ref[...]              # (6, TN) f32
    w1 = w1_ref[...]              # (H, 6)  f32 (torch (out, in) layout)

    # First layer: K=6 contraction as 6 broadcast multiply-adds on the VPU --
    # avoids a tiny-K MXU matmul and any lane concat inside the kernel.
    h = w1[:, 0:1] * pd[0:1, :]                        # (H, 1)*(1, TN) -> (H, TN)
    for k in range(1, 6):
        h = h + w1[:, k:k + 1] * pd[k:k + 1, :]
    h = h + b1_ref[...]                                # + (H, 1) bias (lane bcast)

    # (ReLU, Linear(H, H)) * (n_hidden - 1): bf16 MXU matmuls, f32 accumulation.
    for i in range(n_hidden - 1):
        a = jnp.maximum(h, 0.0).astype(wh_ref.dtype)   # (H, TN) bf16
        h = jnp.dot(wh_ref[i], a,
                    preferred_element_type=jnp.float32) + bh_ref[i]

    # Final ReLU + Linear(H, 4).
    a = jnp.maximum(h, 0.0).astype(wo_ref.dtype)
    rgbd = jnp.dot(wo_ref[...], a,
                   preferred_element_type=jnp.float32) + bo_ref[...]   # (4, TN)

    # Rows 0..2: rgb = sigmoid(.)   Row 3: density = softplus(., threshold=8).
    # Computed full-tile (EUP work is negligible) and selected by row index so
    # the result goes out in a single lane-dense store.
    row = jax.lax.broadcasted_iota(jnp.int32, rgbd.shape, 0)
    sig = jax.nn.sigmoid(rgbd)
    sp = jnp.where(rgbd > 8.0, rgbd,
                   jnp.log1p(jnp.exp(jnp.minimum(rgbd, 8.0))))
    rgbd_ref[...] = jnp.where(row < 3, sig, sp)


def nerf_forward(pos, dir_, params, n_hidden, tile_n=2048,
                 compute_dtype=jnp.bfloat16):
    """Pallas wrapper. pos/dir: (N, 3) f32. Returns (density (N,), rgb (N, 3))."""
    # TODO(synk): n_hidden == 0 (single Linear(6, 4)) path is not wired up here.
    assert n_hidden >= 1
    w1, b1, wh, bh, wo, bo = params
    H = w1.shape[0]
    N = pos.shape[0]

    # Matmul operands in bf16 (f32 accumulation in-kernel); biases stay f32.
    wh_c = wh.astype(compute_dtype)
    wo_c = wo.astype(compute_dtype)

    # Lane-dense layout: rays on the lane axis; one fused (6, N) input slab so
    # the pipeline streams a single input per tile.
    pd_t = jnp.concatenate([pos, dir_], axis=1).T       # (6, N)

    # Tile over rays; lane dim must be a multiple of 128.  Clamp the tile to
    # the (128-rounded) problem size and pad N up to a whole number of tiles.
    n128 = pl.cdiv(N, 128) * 128
    tile_n = max(128, (min(tile_n, n128) // 128) * 128)
    n_pad = pl.cdiv(N, tile_n) * tile_n
    if n_pad != N:
        pd_t = jnp.pad(pd_t, ((0, 0), (0, n_pad - N)))

    kernel = functools.partial(_nerf_kernel, n_hidden)

    # Advisory cost estimate so XLA schedules neighbours around the call well.
    flops = 2 * n_pad * H * (6 + (n_hidden - 1) * H + 4)
    weight_bytes = sum(int(x.size) * x.dtype.itemsize
                       for x in (w1, b1, wh_c, bh, wo_c, bo))
    bytes_accessed = int(pd_t.size) * 4 + weight_bytes + 4 * n_pad * 4
    cost = pl.CostEstimate(flops=int(flops),
                           transcendentals=int(8 * n_pad),
                           bytes_accessed=int(bytes_accessed))

    rgbd_t = pl.pallas_call(
        kernel,
        out_shape=jax.ShapeDtypeStruct((4, n_pad), jnp.float32),
        grid_spec=pltpu.PrefetchScalarGridSpec(
            num_scalar_prefetch=0,
            grid=(n_pad // tile_n,),
            in_specs=[
                pl.BlockSpec((6, tile_n), lambda i: (0, i)),    # pos||dir (6, TN)
                pl.BlockSpec(w1.shape, lambda i: (0, 0)),       # W1 (H, 6) f32
                pl.BlockSpec(b1.shape, lambda i: (0, 0)),       # b1 (H, 1) f32
                pl.BlockSpec(wh_c.shape, lambda i: (0, 0, 0)),  # Wh (L-1, H, H) bf16
                pl.BlockSpec(bh.shape, lambda i: (0, 0, 0)),    # bh (L-1, H, 1) f32
                pl.BlockSpec(wo_c.shape, lambda i: (0, 0)),     # Wo (4, H) bf16
                pl.BlockSpec(bo.shape, lambda i: (0, 0)),       # bo (4, 1) f32
            ],
            out_specs=pl.BlockSpec((4, tile_n), lambda i: (0, i)),  # rgbd (4, TN)
        ),
        compiler_params=pltpu.CompilerParams(
            dimension_semantics=("parallel",),
            vmem_limit_bytes=64 * 1024 * 1024,
        ),
        cost_estimate=cost,
    )(pd_t, w1, b1, wh_c, bh, wo_c, bo)

    rgb = rgbd_t[:3, :N].T          # (N, 3)
    density = rgbd_t[3, :N]         # (N,)
    return density, rgb


def init_params(key, n_hidden, hidden_dim):
    """Deterministic nn.Linear-style init, torch (out, in) weight layout."""
    ks = jax.random.split(key, 6)

    def lin(k, fan_in, fan_out):
        kw, kb = jax.random.split(k)
        bound = 1.0 / jnp.sqrt(fan_in)
        w = jax.random.uniform(kw, (fan_out, fan_in), jnp.float32, -bound, bound)
        b = jax.random.uniform(kb, (fan_out, 1), jnp.float32, -bound, bound)
        return w, b

    w1, b1 = lin(ks[0], 6, hidden_dim)
    if n_hidden >= 2:
        wh_list, bh_list = [], []
        for i in range(n_hidden - 1):
            w, b = lin(jax.random.fold_in(ks[1], i), hidden_dim, hidden_dim)
            wh_list.append(w)
            bh_list.append(b)
        wh = jnp.stack(wh_list, axis=0)                 # (L-1, H, H)
        bh = jnp.stack(bh_list, axis=0)                 # (L-1, H, 1)
    else:
        # Dummy (never read when n_hidden == 1).
        wh = jnp.zeros((1, hidden_dim, hidden_dim), jnp.float32)
        bh = jnp.zeros((1, hidden_dim, 1), jnp.float32)
    wo, bo = lin(ks[2], hidden_dim, 4)
    return (w1, b1, wh, bh, wo, bo)


def nerf_reference(pos, dir_, params, n_hidden):
    """Pure-JAX f32 reference of the torch forward, for correctness checks."""
    w1, b1, wh, bh, wo, bo = params
    h = jnp.concatenate([pos, dir_], axis=1) @ w1.T + b1[:, 0]
    for i in range(n_hidden - 1):
        h = jnp.maximum(h, 0.0) @ wh[i].T + bh[i, :, 0]
    h = jnp.maximum(h, 0.0)
    rgbd = h @ wo.T + bo[:, 0]
    rgb = jax.nn.sigmoid(rgbd[:, :3])
    d = rgbd[:, 3]
    density = jnp.where(d > 8.0, d, jnp.log1p(jnp.exp(jnp.minimum(d, 8.0))))
    return density, rgb


if __name__ == "__main__":
    n_hidden = 4
    hidden_dim = 32
    N = 200  # deliberately not a multiple of 128: exercises the padded path

    key = jax.random.PRNGKey(0)
    k_pos, k_dir, k_par = jax.random.split(key, 3)
    pos = jax.random.normal(k_pos, (N, 3), jnp.float32)
    dir_ = jax.random.normal(k_dir, (N, 3), jnp.float32)
    params = init_params(k_par, n_hidden, hidden_dim)

    fwd = jax.jit(functools.partial(nerf_forward, n_hidden=n_hidden))
    density, rgb = fwd(pos, dir_, params)
    density = jax.block_until_ready(density)
    rgb = jax.block_until_ready(rgb)

    density_ref, rgb_ref = nerf_reference(pos, dir_, params, n_hidden)
    assert density.shape == (N,) and rgb.shape == (N, 3)
    # bf16 MXU operands with f32 accumulation -> relaxed tolerance vs f32 ref.
    assert jnp.allclose(density, density_ref, atol=5e-2, rtol=5e-2)
    assert jnp.allclose(rgb, rgb_ref, atol=5e-2, rtol=5e-2)

    print("KERNEL_OK")
</pallas_src>

<mosaic_0001>
module attributes {stable_mosaic.version = 11 : i64} {
  func.func @_nerf_kernel(%arg0: i32, %arg1: memref<6x256xf32, #tpu.memory_space<vmem>>, %arg2: memref<32x6xf32, #tpu.memory_space<vmem>>, %arg3: memref<32x1xf32, #tpu.memory_space<vmem>>, %arg4: memref<3x32x32xbf16, #tpu.memory_space<vmem>>, %arg5: memref<3x32x1xf32, #tpu.memory_space<vmem>>, %arg6: memref<4x32xbf16, #tpu.memory_space<vmem>>, %arg7: memref<4x1xf32, #tpu.memory_space<vmem>>, %arg8: memref<4x256xf32, #tpu.memory_space<vmem>>) attributes {dimension_semantics = [#tpu.dimension_semantics<parallel>], iteration_bounds = array<i64: 1>, scalar_prefetch = 0 : i64, scratch_operands = 0 : i64, tpu.core_type = #tpu.core_type<tc>, window_params = [{transform_indices = @transform_0, window_bounds = array<i64: 6, 256>}, {pipeline_mode = #tpu.pipeline_mode<synchronous>, transform_indices = @transform_1, window_bounds = array<i64: 32, 6>}, {pipeline_mode = #tpu.pipeline_mode<synchronous>, transform_indices = @transform_2, window_bounds = array<i64: 32, 1>}, {pipeline_mode = #tpu.pipeline_mode<synchronous>, transform_indices = @transform_3, window_bounds = array<i64: 3, 32, 32>}, {pipeline_mode = #tpu.pipeline_mode<synchronous>, transform_indices = @transform_4, window_bounds = array<i64: 3, 32, 1>}, {pipeline_mode = #tpu.pipeline_mode<synchronous>, transform_indices = @transform_5, window_bounds = array<i64: 4, 32>}, {pipeline_mode = #tpu.pipeline_mode<synchronous>, transform_indices = @transform_6, window_bounds = array<i64: 4, 1>}, {transform_indices = @transform_7, window_bounds = array<i64: 4, 256>}]} {
    %c0 = arith.constant 0 : index
    %c0_0 = arith.constant 0 : index
    %0 = vector.load %arg1[%c0, %c0_0] : memref<6x256xf32, #tpu.memory_space<vmem>>, vector<6x256xf32>
    %c0_1 = arith.constant 0 : index
    %c0_2 = arith.constant 0 : index
    %1 = vector.load %arg2[%c0_1, %c0_2] : memref<32x6xf32, #tpu.memory_space<vmem>>, vector<32x6xf32>
    %2 = vector.extract_strided_slice %1 {offsets = [0, 0], sizes = [32, 1], strides = [1, 1]} : vector<32x6xf32> to vector<32x1xf32>
    %3 = vector.extract_strided_slice %0 {offsets = [0, 0], sizes = [1, 256], strides = [1, 1]} : vector<6x256xf32> to vector<1x256xf32>
    %4 = vector.broadcast %2 : vector<32x1xf32> to vector<32x256xf32>
    %5 = vector.broadcast %3 : vector<1x256xf32> to vector<32x256xf32>
    %6 = arith.mulf %4, %5 : vector<32x256xf32>
    %7 = vector.extract_strided_slice %1 {offsets = [0, 1], sizes = [32, 1], strides = [1, 1]} : vector<32x6xf32> to vector<32x1xf32>
    %8 = vector.extract_strided_slice %0 {offsets = [1, 0], sizes = [1, 256], strides = [1, 1]} : vector<6x256xf32> to vector<1x256xf32>
    %9 = vector.broadcast %7 : vector<32x1xf32> to vector<32x256xf32>
    %10 = vector.broadcast %8 : vector<1x256xf32> to vector<32x256xf32>
    %11 = arith.mulf %9, %10 : vector<32x256xf32>
    %12 = arith.addf %6, %11 : vector<32x256xf32>
    %13 = vector.extract_strided_slice %1 {offsets = [0, 2], sizes = [32, 1], strides = [1, 1]} : vector<32x6xf32> to vector<32x1xf32>
    %14 = vector.extract_strided_slice %0 {offsets = [2, 0], sizes = [1, 256], strides = [1, 1]} : vector<6x256xf32> to vector<1x256xf32>
    %15 = vector.broadcast %13 : vector<32x1xf32> to vector<32x256xf32>
    %16 = vector.broadcast %14 : vector<1x256xf32> to vector<32x256xf32>
    %17 = arith.mulf %15, %16 : vector<32x256xf32>
    %18 = arith.addf %12, %17 : vector<32x256xf32>
    %19 = vector.extract_strided_slice %1 {offsets = [0, 3], sizes = [32, 1], strides = [1, 1]} : vector<32x6xf32> to vector<32x1xf32>
    %20 = vector.extract_strided_slice %0 {offsets = [3, 0], sizes = [1, 256], strides = [1, 1]} : vector<6x256xf32> to vector<1x256xf32>
    %21 = vector.broadcast %19 : vector<32x1xf32> to vector<32x256xf32>
    %22 = vector.broadcast %20 : vector<1x256xf32> to vector<32x256xf32>
    %23 = arith.mulf %21, %22 : vector<32x256xf32>
    %24 = arith.addf %18, %23 : vector<32x256xf32>
    %25 = vector.extract_strided_slice %1 {offsets = [0, 4], sizes = [32, 1], strides = [1, 1]} : vector<32x6xf32> to vector<32x1xf32>
    %26 = vector.extract_strided_slice %0 {offsets = [4, 0], sizes = [1, 256], strides = [1, 1]} : vector<6x256xf32> to vector<1x256xf32>
    %27 = vector.broadcast %25 : vector<32x1xf32> to vector<32x256xf32>
    %28 = vector.broadcast %26 : vector<1x256xf32> to vector<32x256xf32>
    %29 = arith.mulf %27, %28 : vector<32x256xf32>
    %30 = arith.addf %24, %29 : vector<32x256xf32>
    %31 = vector.extract_strided_slice %1 {offsets = [0, 5], sizes = [32, 1], strides = [1, 1]} : vector<32x6xf32> to vector<32x1xf32>
    %32 = vector.extract_strided_slice %0 {offsets = [5, 0], sizes = [1, 256], strides = [1, 1]} : vector<6x256xf32> to vector<1x256xf32>
    %33 = vector.broadcast %31 : vector<32x1xf32> to vector<32x256xf32>
    %34 = vector.broadcast %32 : vector<1x256xf32> to vector<32x256xf32>
    %35 = arith.mulf %33, %34 : vector<32x256xf32>
    %36 = arith.addf %30, %35 : vector<32x256xf32>
    %c0_3 = arith.constant 0 : index
    %c0_4 = arith.constant 0 : index
    %37 = vector.load %arg3[%c0_3, %c0_4] : memref<32x1xf32, #tpu.memory_space<vmem>>, vector<32x1xf32>
    %38 = vector.broadcast %37 : vector<32x1xf32> to vector<32x256xf32>
    %39 = arith.addf %36, %38 : vector<32x256xf32>
    %cst = arith.constant 0.000000e+00 : f32
    %40 = vector.broadcast %cst : f32 to vector<32x256xf32>
    %41 = arith.maximumf %39, %40 : vector<32x256xf32>
    %42 = arith.truncf %41 : vector<32x256xf32> to vector<32x256xbf16>
    %c0_5 = arith.constant 0 : index
    %c0_6 = arith.constant 0 : index
    %c0_7 = arith.constant 0 : index
    %43 = vector.load %arg4[%c0_5, %c0_6, %c0_7] : memref<3x32x32xbf16, #tpu.memory_space<vmem>>, vector<1x32x32xbf16>
    %44 = vector.shape_cast %43 : vector<1x32x32xbf16> to vector<32x32xbf16>
    %cst_8 = arith.constant dense<0.000000e+00> : vector<32x256xf32>
    %45 = tpu.matmul %44, %42, %cst_8 {dimension_numbers = #tpu.dot_dimension_numbers<[1], [0], [0], [1], [0, 0, 1, 1], [], []>} : vector<32x32xbf16>, vector<32x256xbf16>, vector<32x256xf32> -> vector<32x256xf32>
    %c0_9 = arith.constant 0 : index
    %c0_10 = arith.constant 0 : index
    %c0_11 = arith.constant 0 : index
    %46 = vector.load %arg5[%c0_9, %c0_10, %c0_11] : memref<3x32x1xf32, #tpu.memory_space<vmem>>, vector<1x32x1xf32>
    %47 = vector.shape_cast %46 : vector<1x32x1xf32> to vector<32x1xf32>
    %48 = vector.broadcast %47 : vector<32x1xf32> to vector<32x256xf32>
    %49 = arith.addf %45, %48 : vector<32x256xf32>
    %cst_12 = arith.constant 0.000000e+00 : f32
    %50 = vector.broadcast %cst_12 : f32 to vector<32x256xf32>
    %51 = arith.maximumf %49, %50 : vector<32x256xf32>
    %52 = arith.truncf %51 : vector<32x256xf32> to vector<32x256xbf16>
    %c1 = arith.constant 1 : index
    %c0_13 = arith.constant 0 : index
    %c0_14 = arith.constant 0 : index
    %53 = vector.load %arg4[%c1, %c0_13, %c0_14] : memref<3x32x32xbf16, #tpu.memory_space<vmem>>, vector<1x32x32xbf16>
    %54 = vector.shape_cast %53 : vector<1x32x32xbf16> to vector<32x32xbf16>
    %cst_15 = arith.constant dense<0.000000e+00> : vector<32x256xf32>
    %55 = tpu.matmul %54, %52, %cst_15 {dimension_numbers = #tpu.dot_dimension_numbers<[1], [0], [0], [1], [0, 0, 1, 1], [], []>} : vector<32x32xbf16>, vector<32x256xbf16>, vector<32x256xf32> -> vector<32x256xf32>
    %c1_16 = arith.constant 1 : index
    %c0_17 = arith.constant 0 : index
    %c0_18 = arith.constant 0 : index
    %56 = vector.load %arg5[%c1_16, %c0_17, %c0_18] : memref<3x32x1xf32, #tpu.memory_space<vmem>>, vector<1x32x1xf32>
    %57 = vector.shape_cast %56 : vector<1x32x1xf32> to vector<32x1xf32>
    %58 = vector.broadcast %57 : vector<32x1xf32> to vector<32x256xf32>
    %59 = arith.addf %55, %58 : vector<32x256xf32>
    %cst_19 = arith.constant 0.000000e+00 : f32
    %60 = vector.broadcast %cst_19 : f32 to vector<32x256xf32>
    %61 = arith.maximumf %59, %60 : vector<32x256xf32>
    %62 = arith.truncf %61 : vector<32x256xf32> to vector<32x256xbf16>
    %c2 = arith.constant 2 : index
    %c0_20 = arith.constant 0 : index
    %c0_21 = arith.constant 0 : index
    %63 = vector.load %arg4[%c2, %c0_20, %c0_21] : memref<3x32x32xbf16, #tpu.memory_space<vmem>>, vector<1x32x32xbf16>
    %64 = vector.shape_cast %63 : vector<1x32x32xbf16> to vector<32x32xbf16>
    %cst_22 = arith.constant dense<0.000000e+00> : vector<32x256xf32>
    %65 = tpu.matmul %64, %62, %cst_22 {dimension_numbers = #tpu.dot_dimension_numbers<[1], [0], [0], [1], [0, 0, 1, 1], [], []>} : vector<32x32xbf16>, vector<32x256xbf16>, vector<32x256xf32> -> vector<32x256xf32>
    %c2_23 = arith.constant 2 : index
    %c0_24 = arith.constant 0 : index
    %c0_25 = arith.constant 0 : index
    %66 = vector.load %arg5[%c2_23, %c0_24, %c0_25] : memref<3x32x1xf32, #tpu.memory_space<vmem>>, vector<1x32x1xf32>
    %67 = vector.shape_cast %66 : vector<1x32x1xf32> to vector<32x1xf32>
    %68 = vector.broadcast %67 : vector<32x1xf32> to vector<32x256xf32>
    %69 = arith.addf %65, %68 : vector<32x256xf32>
    %cst_26 = arith.constant 0.000000e+00 : f32
    %70 = vector.broadcast %cst_26 : f32 to vector<32x256xf32>
    %71 = arith.maximumf %69, %70 : vector<32x256xf32>
    %72 = arith.truncf %71 : vector<32x256xf32> to vector<32x256xbf16>
    %c0_27 = arith.constant 0 : index
    %c0_28 = arith.constant 0 : index
    %73 = vector.load %arg6[%c0_27, %c0_28] : memref<4x32xbf16, #tpu.memory_space<vmem>>, vector<4x32xbf16>
    %cst_29 = arith.constant dense<0.000000e+00> : vector<4x256xf32>
    %74 = tpu.matmul %73, %72, %cst_29 {dimension_numbers = #tpu.dot_dimension_numbers<[1], [0], [0], [1], [0, 0, 1, 1], [], []>} : vector<4x32xbf16>, vector<32x256xbf16>, vector<4x256xf32> -> vector<4x256xf32>
    %c0_30 = arith.constant 0 : index
    %c0_31 = arith.constant 0 : index
    %75 = vector.load %arg7[%c0_30, %c0_31] : memref<4x1xf32, #tpu.memory_space<vmem>>, vector<4x1xf32>
    %76 = vector.broadcast %75 : vector<4x1xf32> to vector<4x256xf32>
    %77 = arith.addf %74, %76 : vector<4x256xf32>
    %78 = tpu.iota {dimensions = array<i32: 0>} : vector<4x256xi32>
    %79 = arith.negf %77 : vector<4x256xf32>
    %80 = math.exp %79 : vector<4x256xf32>
    %cst_32 = arith.constant 1.000000e+00 : f32
    %81 = vector.broadcast %cst_32 : f32 to vector<4x256xf32>
    %82 = arith.addf %81, %80 : vector<4x256xf32>
    %83 = arith.divf %81, %82 : vector<4x256xf32>
    %cst_33 = arith.constant 8.000000e+00 : f32
    %84 = vector.broadcast %cst_33 : f32 to vector<4x256xf32>
    %85 = arith.cmpf ogt, %77, %84 : vector<4x256xf32>
    %cst_34 = arith.constant 8.000000e+00 : f32
    %86 = vector.broadcast %cst_34 : f32 to vector<4x256xf32>
    %87 = arith.minimumf %77, %86 : vector<4x256xf32>
    %88 = math.exp %87 : vector<4x256xf32>
    %89 = math.log1p %88 : vector<4x256xf32>
    %90 = arith.select %85, %77, %89 : vector<4x256xi1>, vector<4x256xf32>
    %c3_i32 = arith.constant 3 : i32
    %91 = vector.broadcast %c3_i32 : i32 to vector<4x256xi32>
    %92 = arith.cmpi slt, %78, %91 : vector<4x256xi32>
    %93 = arith.select %92, %83, %90 : vector<4x256xi1>, vector<4x256xf32>
    %c0_35 = arith.constant 0 : index
    %c0_36 = arith.constant 0 : index
    %94 = vector.load %arg8[%c0_35, %c0_36] : memref<4x256xf32, #tpu.memory_space<vmem>>, vector<4x256xf32>
    tpu.vector_store %arg8[%c0_35, %c0_36], %93 {strides = array<i32>} : memref<4x256xf32, #tpu.memory_space<vmem>>, vector<4x256xf32>,
    return
  }
  func.func @transform_0(%arg0: i32) -> (i32, i32) {
    %c0_i32 = arith.constant 0 : i32
    %c0_i32_0 = arith.constant 0 : i32
    return %c0_i32, %arg0 : i32, i32
  }
  func.func @transform_1(%arg0: i32) -> (i32, i32) {
    %c0_i32 = arith.constant 0 : i32
    %c0_i32_0 = arith.constant 0 : i32
    %c0_i32_1 = arith.constant 0 : i32
    return %c0_i32, %c0_i32_0 : i32, i32
  }
  func.func @transform_2(%arg0: i32) -> (i32, i32) {
    %c0_i32 = arith.constant 0 : i32
    %c0_i32_0 = arith.constant 0 : i32
    %c0_i32_1 = arith.constant 0 : i32
    return %c0_i32, %c0_i32_0 : i32, i32
  }
  func.func @transform_3(%arg0: i32) -> (i32, i32, i32) {
    %c0_i32 = arith.constant 0 : i32
    %c0_i32_0 = arith.constant 0 : i32
    %c0_i32_1 = arith.constant 0 : i32
    %c0_i32_2 = arith.constant 0 : i32
    return %c0_i32, %c0_i32_0, %c0_i32_1 : i32, i32, i32
  }
  func.func @transform_4(%arg0: i32) -> (i32, i32, i32) {
    %c0_i32 = arith.constant 0 : i32
    %c0_i32_0 = arith.constant 0 : i32
    %c0_i32_1 = arith.constant 0 : i32
    %c0_i32_2 = arith.constant 0 : i32
    return %c0_i32, %c0_i32_0, %c0_i32_1 : i32, i32, i32
  }
  func.func @transform_5(%arg0: i32) -> (i32, i32) {
    %c0_i32 = arith.constant 0 : i32
    %c0_i32_0 = arith.constant 0 : i32
    %c0_i32_1 = arith.constant 0 : i32
    return %c0_i32, %c0_i32_0 : i32, i32
  }
  func.func @transform_6(%arg0: i32) -> (i32, i32) {
    %c0_i32 = arith.constant 0 : i32
    %c0_i32_0 = arith.constant 0 : i32
    %c0_i32_1 = arith.constant 0 : i32
    return %c0_i32, %c0_i32_0 : i32, i32
  }
  func.func @transform_7(%arg0: i32) -> (i32, i32) {
    %c0_i32 = arith.constant 0 : i32
    %c0_i32_0 = arith.constant 0 : i32
    return %c0_i32, %arg0 : i32, i32
  }
}

</mosaic_0001>

<bundles_post_ra>
// kernel: nerf_forward.1
= control target key start
LH: loop header
LB: loop body
LE: loop exit
PB: predicated region body
PF: predicated region fallthrough
CT: control target
= control target key end

     0   :  { %v788_v0 = vmov 2   ;;  %v789_v1 = vmov 1   ;;  %v790_v5 = vmov 4   ;;  %v791_v7 = vmov 0   ;;  %s1018_s1 = inlined_call_operand.vmem [shape: f32[32,6], index: 1, kind: input, shape index: {}]   ;;  %s1019_s2 = inlined_call_operand.vmem [shape: f32[32,1], index: 2, kind: input, shape index: {}]   ;;  %s1020_s4 = inlined_call_operand.vmem [shape: f32[3,32,1], index: 4, kind: input, shape index: {}]   ;;  %s1021_s6 = inlined_call_operand.vmem [shape: f32[4,1], index: 6, kind: input, shape index: {}]   ;;  %s1022_s0 = inlined_call_operand.vmem [shape: f32[6,256], index: 0, kind: input, shape index: {}]   ;;  %s1023_s3 = inlined_call_operand.vmem [shape: bf16[3,32,32], index: 3, kind: input, shape index: {}]   ;;  %s1024_s5 = inlined_call_operand.vmem [shape: bf16[4,32], index: 5, kind: input, shape index: {}]   ;;  %s1025_s7 = inlined_call_operand.vmem [shape: f32[4,256], index: 7, kind: output, shape index: {}]  }
   0x1   :  { %751 = vset.pattern.permute.xlu2 %v788_v0  ;;  %754 = vset.pattern.permute.xlu0 %v789_v1  ;;  %v31_v2 = vld [vmem:[%s1018_s1 + $0x10] sm:$0xff]  ;;  %v30_v3 = vld [vmem:[%s1018_s1 + $0x8] sm:$0xff]  ;;  %v32_v4 = vld [vmem:[%s1018_s1 + $0x18] sm:$0xff]  ;;  %v792_v8 = vmov 5   ;;  %v793_v9 = vmov 3   ;;  %vm315_vm0 = vcmask 261120  }
   0x2   :  { %750 = vset.pattern.permute.xlu1 %v789_v1  ;;  %106 = vperm.xlu2 %751, %v31_v2   ;;  %v29_v6 = vld [vmem:[%s1018_s1] sm:$0xff]  ;;  %v235_v10 = vld [vmem:[%s1019_s2 + $0x10] sm:$0xff]  ;;  %v284_v11 = vld [vmem:[%s1020_s4 + $0x18] sm:$0xff]  ;;  %vm674_vm14 = vcmask 1043456  }
   0x3   :  { %72 = vperm.xlu1 %750, %v31_v2   ;;  %68 = vperm.xlu0 %754, %v30_v3   ;;  %v700_v12 = vld [vmem:[%s1020_s4 + $0x30] sm:$0xff]  ;;  %v699_v13 = vld [vmem:[%s1020_s4 + $0x28] sm:$0xff]  ;;  %v236_v14 = vld [vmem:[%s1019_s2 + $0x18] sm:$0xff] }
   0x4   :  { %v233_v15 = vld [vmem:[%s1019_s2] sm:$0xff]  ;;  %v234_v17 = vld [vmem:[%s1019_s2 + $0x8] sm:$0xff]  ;;  %v283_v18 = vld [vmem:[%s1020_s4 + $0x10] sm:$0xff] }
   0x5   :  { %v718_v16 = vld [vmem:[%s1020_s4 + $0x40] sm:$0xff]  ;;  %v282_v20 = vld [vmem:[%s1020_s4 + $0x8] sm:$0xff]  ;;  %v701_v21 = vld [vmem:[%s1020_s4 + $0x38] sm:$0xff] }
   0x6   :  { %v281_v19 = vld [vmem:[%s1020_s4] sm:$0xff]  ;;  %v720_v23 = vld [vmem:[%s1020_s4 + $0x50] sm:$0xff]  ;;  %v721_v24 = vld [vmem:[%s1020_s4 + $0x58] sm:$0xff] }
   0x7   :  { %v698_v22 = vld [vmem:[%s1020_s4 + $0x20] sm:$0xff]  ;;  %v719_v27 = vld [vmem:[%s1020_s4 + $0x48] sm:$0xff] }
   0x8   :  { %v565_v28 = vld [vmem:[%s1021_s6] sm:$0xf]  ;;  %v28_v44 = vld [vmem:[%s1022_s0 + $0x8] sm:$0x3f] }
   0x9   :  { %v27_v43 = vld [vmem:[%s1022_s0] sm:$0x3f]  ;;  %v80_v47 = vperm.slane %v28_v44, 1  ;;  %v54_v49 = vperm.slane %v28_v44, 0  ;;  %v915_v52 = vperm.slane %v28_v44, 2 }
   0xa   :  { %110 = vperm.xlu2 %751, %v32_v4   ;;  %v79_v46 = vperm.slane %v27_v43, 1  ;;  %v53_v48 = vperm.slane %v27_v43, 0  ;;  %v913_v51 = vperm.slane %v27_v43, 2 }
   0xb   :  { %76 = vperm.xlu1 %750, %v32_v4   ;;  %759 = vset.pattern.permute.xlu0 %v790_v5 }
   0xc   :  { %174 = vperm.xlu0 %759, %v31_v2  }
  0x12   :  { %753 = vset.pattern.permute.xlu2 %v789_v1 }
  0x13   :  { %752 = vset.pattern.permute.xlu1 %v791_v7  ;;  %64 = vperm.xlu2 %753, %v29_v6  }
  0x14   :  { %764 = vset.pattern.permute.xlu0 %v792_v8  ;;  %40 = vperm.xlu1 %752, %v30_v3  }
  0x15   :  { %212 = vperm.xlu0 %764, %v32_v4  }
  0x1b   :  { %756 = vset.pattern.permute.xlu2 %v793_v9 }
  0x1c   :  { %755 = vset.pattern.permute.xlu1 %v793_v9  ;;  %144 = vperm.xlu2 %756, %v32_v4  }
  0x1d   :  { %765 = vset.pattern.permute.xlu0 %v791_v7  ;;  %140 = vperm.xlu1 %755, %v31_v2  }
  0x1e   :  { %45 = vperm.xlu0 %765, %v31_v2  }
  0x24   :  { %758 = vset.pattern.permute.xlu2 %v788_v0 }
  0x25   :  { %757 = vset.pattern.permute.xlu1 %v788_v0  ;;  %102 = vperm.xlu2 %758, %v30_v3  }
  0x26   :  { %50 = vperm.xlu0 %765, %v32_v4   ;;  %98 = vperm.xlu1 %757, %v29_v6  }
  0x2d   :  { %761 = vset.pattern.permute.xlu2 %v793_v9 }
  0x2e   :  { %35 = vperm.xlu0 %765, %v29_v6   ;;  %760 = vset.pattern.permute.xlu1 %v790_v5 }
  0x2f   :  { %178 = vperm.xlu1 %760, %v32_v4   ;;  %132 = vperm.xlu2 %761, %v29_v6  }
  0x36   :  { %249 = vperm.xlu0 %765, %v235_v10   ;;  %v929_v10 = vperm.slane %v28_v44, 5 }
  0x37   :  { %762 = vset.pattern.permute.xlu1 %v793_v9  ;;  %763 = vset.pattern.permute.xlu2 %v792_v8  ;;  %v927_v9 = vperm.slane %v27_v43, 5 }
  0x38   :  { %136 = vperm.xlu1 %762, %v30_v3   ;;  %208 = vperm.xlu2 %763, %v31_v2   ;;  %v147_v2 = vperm.slane %v27_v43, 3 }
  0x3e   :  { %302 = vperm.xlu0 %765, %v284_v11  }
  0x40   :  { %766 = vset.pattern.permute.xlu1 %v790_v5  ;;  %767 = vset.pattern.permute.xlu2 %v790_v5 }
  0x41   :  { %166 = vperm.xlu1 %766, %v29_v6   ;;  %170 = vperm.xlu2 %767, %v30_v3  }
  0x46   :  { %394 = vperm.xlu0 %765, %v700_v12  }
  0x49   :  { %768 = vset.pattern.permute.xlu1 %v792_v8  ;;  %769 = vset.pattern.permute.xlu2 %v792_v8 }
  0x4a   :  { %200 = vperm.xlu1 %768, %v29_v6   ;;  %204 = vperm.xlu2 %769, %v30_v3   ;;  %v148_v3 = vperm.slane %v28_v44, 3  ;;  %v921_v6 = vperm.slane %v27_v43, 4 }
  0x4e   :  { %389 = vperm.xlu0 %765, %v699_v13  }
  0x52   :  { %770 = vset.pattern.permute.xlu1 %v791_v7  ;;  %771 = vset.pattern.permute.xlu2 %v791_v7  ;;  %v923_v7 = vperm.slane %v28_v44, 4 }
  0x53   :  { %254 = vperm.xlu1 %770, %v236_v14   ;;  %239 = vperm.xlu2 %771, %v233_v15  }
  0x56   :  { %480 = vperm.xlu0 %765, %v718_v16  }
  0x5b   :  { %244 = vperm.xlu1 %770, %v234_v17   ;;  %297 = vperm.xlu2 %771, %v283_v18  }
  0x5c   :  { %v107_v25 = vpop.permute.xlu2 %106 }
  0x5d   :  { %v119_v60 = vmul.f32 %v913_v51, %v107_v25  ;;  %v120_v61 = vmul.f32 %v915_v52, %v107_v25 }
  0x63   :  { %287 = vperm.xlu1 %770, %v281_v19   ;;  %292 = vperm.xlu2 %771, %v282_v20  }
  0x64   :  { %v111_v29 = vpop.permute.xlu2 %110 }
  0x65   :  { %v121_v4 = vmul.f32 %v913_v51, %v111_v29  ;;  %v122_v5 = vmul.f32 %v915_v52, %v111_v29 }
  0x6b   :  { %399 = vperm.xlu1 %770, %v701_v21   ;;  %384 = vperm.xlu2 %771, %v698_v22  }
  0x6d   :  { %v65_v32 = vpop.permute.xlu2 %64 }
  0x6e   :  { %v81_v13 = vmul.f32 %v79_v46, %v65_v32  ;;  %v82_v14 = vmul.f32 %v80_v47, %v65_v32 }
  0x73   :  { %490 = vperm.xlu1 %770, %v720_v23   ;;  %495 = vperm.xlu2 %771, %v721_v24  }
  0x75   :  { %v73_v26 = vpop.permute.xlu1 %72  ;;  %v69_v31 = vpop.permute.xlu0 %68 }
  0x76   :  { %v145_v35 = vpop.permute.xlu2 %144  ;;  %v85_v56 = vmul.f32 %v79_v46, %v73_v26  ;;  %v86_v57 = vmul.f32 %v80_v47, %v73_v26  ;;  %v83_v18 = vmul.f32 %v79_v46, %v69_v31  ;;  %v84_v19 = vmul.f32 %v80_v47, %v69_v31 }
  0x77   :  { %v155_v20 = vmul.f32 %v147_v2, %v145_v35  ;;  %v156_v21 = vmul.f32 %v148_v3, %v145_v35 }
  0x7b   :  { %485 = vperm.xlu1 %770, %v719_v27   ;;  %568 = vperm.xlu2 %771, %v565_v28  }
  0x7d   :  { %v77_v30 = vpop.permute.xlu1 %76 }
  0x7e   :  { %v897_v34 = vpop.permute.xlu0 %174  ;;  %v87_v0 = vmul.f32 %v79_v46, %v77_v30  ;;  %v88_v1 = vmul.f32 %v80_v47, %v77_v30 }
  0x7f   :  { %v103_v39 = vpop.permute.xlu2 %102  ;;  %v188_v32 = vmul.f32 %v923_v7, %v897_v34 }
  0x80   :  { %v117_v31 = vmul.f32 %v913_v51, %v103_v39  ;;  %v118_v35 = vmul.f32 %v915_v52, %v103_v39 }
  0x86   :  { %v41_v33 = vpop.permute.xlu1 %40 }
  0x87   :  { %v899_v37 = vpop.permute.xlu0 %212  ;;  %v57_v22 = vmul.f32 %v53_v48, %v41_v33  ;;  %v58_v23 = vmul.f32 %v54_v49, %v41_v33 }
  0x89   :  { %v903_v42 = vpop.permute.xlu2 %132  ;;  %v91_v46 = vadd.f32 %v83_v18, %v57_v22  ;;  %v92_v47 = vadd.f32 %v84_v19, %v58_v23 }
  0x8f   :  { %v141_v36 = vpop.permute.xlu1 %140 }
  0x90   :  { %v46_v40 = vpop.permute.xlu0 %45  ;;  %v153_v24 = vmul.f32 %v147_v2, %v141_v36  ;;  %v154_v25 = vmul.f32 %v148_v3, %v141_v36 }
  0x91   :  { %v59_v53 = vmul.f32 %v53_v48, %v46_v40  ;;  %v60_v54 = vmul.f32 %v54_v49, %v46_v40  ;;  %v187_v40 = vmul.f32 %v921_v6, %v897_v34 }
  0x92   :  { %v209_v55 = vpop.permute.xlu2 %208 }
  0x93   :  { %v93_v62 = vadd.f32 %v85_v56, %v59_v53  ;;  %v94_v63 = vadd.f32 %v86_v57, %v60_v54  ;;  %v221_v57 = vmul.f32 %v927_v9, %v209_v55  ;;  %v222_v39 = vmul.f32 %v929_v10, %v209_v55 }
  0x95   :  { %v127_v15 = vadd.f32 %v119_v60, %v93_v62  ;;  %v128_v16 = vadd.f32 %v120_v61, %v94_v63  ;;  %v150_v63 = vmul.f32 %v148_v3, %v903_v42 }
  0x97   :  { %v161_v43 = vadd.f32 %v153_v24, %v127_v15  ;;  %v162_v44 = vadd.f32 %v154_v25, %v128_v16 }
  0x98   :  { %v901_v38 = vpop.permute.xlu1 %98  ;;  %v51_v50 = vpop.permute.xlu0 %50 }
  0x99   :  { %v61_v58 = vmul.f32 %v53_v48, %v51_v50  ;;  %v62_v59 = vmul.f32 %v54_v49, %v51_v50  ;;  %v116_v60 = vmul.f32 %v915_v52, %v901_v38 }
  0x9b   :  { %v95_v11 = vadd.f32 %v87_v0, %v61_v58  ;;  %v96_v12 = vadd.f32 %v88_v1, %v62_v59  ;;  %v171_v26 = vpop.permute.xlu2 %170  ;;  %v195_v58 = vadd.f32 %v187_v40, %v161_v43  ;;  %v196_v59 = vadd.f32 %v188_v32, %v162_v44 }
  0x9d   :  { %v129_v27 = vadd.f32 %v121_v4, %v95_v11  ;;  %v130_v28 = vadd.f32 %v122_v5, %v96_v12  ;;  %v125_v11 = vadd.f32 %v117_v31, %v91_v46  ;;  %v126_v12 = vadd.f32 %v118_v35, %v92_v47 }
  0x9e   :  { %v229_v52 = vadd.f32 %v221_v57, %v195_v58  ;;  %v739_v58 = vld [vmem:[%s1023_s3 + $0x8] sm:$0xff] }
  0x9f   :  { %v163_v53 = vadd.f32 %v155_v20, %v129_v27  ;;  %v164_v54 = vadd.f32 %v156_v21, %v130_v28 }
  0xa0   :  { %v36_v17 = vpop.permute.xlu0 %35 }
  0xa1   :  { %v179_v41 = vpop.permute.xlu1 %178  ;;  %v55_v29 = vmul.f32 %v53_v48, %v36_v17  ;;  %v56_v30 = vmul.f32 %v54_v49, %v36_v17  ;;  %v223_v48 = vmul.f32 %v927_v9, %v899_v37  ;;  %v224_v49 = vmul.f32 %v929_v10, %v899_v37 }
  0xa2   :  { %v189_v33 = vmul.f32 %v921_v6, %v179_v41  ;;  %v190_v36 = vmul.f32 %v923_v7, %v179_v41  ;;  %v115_v41 = vmul.f32 %v913_v51, %v901_v38  ;;  %v149_v37 = vmul.f32 %v147_v2, %v903_v42 }
  0xa3   :  { %v89_v50 = vadd.f32 %v81_v13, %v55_v29  ;;  %v90_v34 = vadd.f32 %v82_v14, %v56_v30  ;;  %v185_v51 = vmul.f32 %v921_v6, %v171_v26  ;;  %v186_v13 = vmul.f32 %v923_v7, %v171_v26 }
  0xa4   :  { %v197_v61 = vadd.f32 %v189_v33, %v163_v53  ;;  %v198_v62 = vadd.f32 %v190_v36, %v164_v54  ;;  %v205_v38 = vpop.permute.xlu2 %204  ;;  %v230_v14 = vadd.f32 %v222_v39, %v196_v59  ;;  %v738_v39 = vld [vmem:[%s1023_s3] sm:$0xff] }
  0xa5   :  { %v123_v4 = vadd.f32 %v115_v41, %v89_v50  ;;  %v124_v55 = vadd.f32 %v116_v60, %v90_v34  ;;  %v219_v23 = vmul.f32 %v927_v9, %v205_v38  ;;  %v220_v24 = vmul.f32 %v929_v10, %v205_v38 }
  0xa7   :  { %v157_v19 = vadd.f32 %v149_v37, %v123_v4  ;;  %v158_v20 = vadd.f32 %v150_v63, %v124_v55 }
  0xa8   :  { %v250_v5 = vpop.permute.xlu0 %249 }
  0xa9   :  { %v262_v16 = vadd.f32 %v250_v5, %v230_v14 }
  0xaa   :  { %v911_v45 = vpop.permute.xlu1 %136 }
  0xab   :  { %v151_v0 = vmul.f32 %v147_v2, %v911_v45  ;;  %v152_v1 = vmul.f32 %v148_v3, %v911_v45  ;;  %v231_v2 = vadd.f32 %v223_v48, %v197_v61  ;;  %v232_v45 = vadd.f32 %v224_v49, %v198_v62 }
  0xac   :  { %v261_v3 = vadd.f32 %v250_v5, %v229_v52  ;;  %v270_v28 = vmax.f32 %v262_v16, 0.0 }
  0xad   :  { %v159_v17 = vadd.f32 %v151_v0, %v125_v11  ;;  %v160_v18 = vadd.f32 %v152_v1, %v126_v12  ;;  %v240_v33 = vpop.permute.xlu2 %239 }
  0xae   :  { %v269_v27 = vmax.f32 %v261_v3, 0.0 }
  0xaf   :  { %v193_v29 = vadd.f32 %v185_v51, %v159_v17  ;;  %v194_v30 = vadd.f32 %v186_v13, %v160_v18 }
  0xb0   :  { %v303_v0 = vpop.permute.xlu0 %302 }
  0xb1   :  { %v227_v36 = vadd.f32 %v219_v23, %v193_v29 }
  0xb3   :  { %v925_v8 = vpop.permute.xlu1 %166 }
  0xb4   :  { %v183_v15 = vmul.f32 %v921_v6, %v925_v8  ;;  %v184_v42 = vmul.f32 %v923_v7, %v925_v8 }
  0xb5   :  { %v298_v62 = vpop.permute.xlu2 %297 }
  0xb6   :  { %v191_v25 = vadd.f32 %v183_v15, %v157_v19  ;;  %v192_v26 = vadd.f32 %v184_v42, %v158_v20 }
  0xbc   :  { %v201_v56 = vpop.permute.xlu1 %200 }
  0xbd   :  { %v217_v21 = vmul.f32 %v927_v9, %v201_v56  ;;  %v218_v22 = vmul.f32 %v929_v10, %v201_v56  ;;  %v228_v9 = vadd.f32 %v220_v24, %v194_v30  ;;  %v293_v1 = vpop.permute.xlu2 %292  ;;  %v740_v24 = vld [vmem:[%s1023_s3 + $0x10] sm:$0xff] }
  0xbf   :  { %v225_v40 = vadd.f32 %v217_v21, %v191_v25  ;;  %v226_v32 = vadd.f32 %v218_v22, %v192_v26 }
  0xc1   :  { %v257_v10 = vadd.f32 %v240_v33, %v225_v40  ;;  %v258_v46 = vadd.f32 %v240_v33, %v226_v32 }
  0xc3   :  { %v265_v53 = vmax.f32 %v257_v10, 0.0  ;;  %v266_v54 = vmax.f32 %v258_v46, 0.0 }
  0xc5   :  { %v255_v6 = vpop.permute.xlu1 %254 }
  0xc6   :  { %v263_v7 = vadd.f32 %v255_v6, %v231_v2  ;;  %v264_v8 = vadd.f32 %v255_v6, %v232_v45  ;;  %v741_v6 = vld [vmem:[%s1023_s3 + $0x18] sm:$0xff] }
  0xc8   :  { %v271_v43 = vmax.f32 %v263_v7, 0.0  ;;  %v272_v44 = vmax.f32 %v264_v8, 0.0 }
  0xca   :  { %v275_v31 = vpack.c.bf16 %v271_v43, %v269_v27  ;;  %v276_v35 = vpack.c.bf16 %v272_v44, %v270_v28  ;;  %v395_v27 = vpop.permute.xlu0 %394 }
  0xcc   :  { %328 = vmatpush.bf16.msra.mxu0 %v275_v31  ;;  %347 = vmatpush.bf16.msra.mxu1 %v276_v35  ;;  %v385_v35 = vpop.permute.xlu2 %384 }
  0xcd   :  { %v245_v47 = vpop.permute.xlu1 %244 }
  0xce   :  { %v259_v48 = vadd.f32 %v245_v47, %v227_v36  ;;  %v260_v49 = vadd.f32 %v245_v47, %v228_v9 }
  0xd0   :  { %v267_v50 = vmax.f32 %v259_v48, 0.0  ;;  %v268_v34 = vmax.f32 %v260_v49, 0.0 }
  0xd2   :  { %v273_v56 = vpack.c.bf16 %v267_v50, %v265_v53  ;;  %v274_v57 = vpack.c.bf16 %v268_v34, %v266_v54  ;;  %v390_v30 = vpop.permute.xlu0 %389 }
  0xd4   :  { %329 = vmatpush.bf16.msra.mxu0 %v273_v56  ;;  %348 = vmatpush.bf16.msra.mxu1 %v274_v57 }
  0xd5   :  { %v288_v12 = vpop.permute.xlu1 %287 }
  0xd7   :  { %690 = vmatmul.msk.bf16.vlgmr.msra.gmra.mxu0 %vm315_vm0, %v738_v39  ;;  %692 = vmatmul.msk.bf16.vlgmr.msra.gmra.mxu1 %vm315_vm0, %v738_v39 }
  0xdd   :  { %v400_v40 = vpop.permute.xlu1 %399 }
  0xe7   :  { %691 = vmatmul.msk.bf16.gmra.mxu0 %vm315_vm0, %v739_v58  ;;  %693 = vmatmul.msk.bf16.gmra.mxu1 %vm315_vm0, %v739_v58 }
 0x154   :  { %v331_v59 = vpop.f32.mrf.mxu0  ;;  %v350_v41 = vpop.f32.mrf.mxu1 }
 0x155   :  { %v332_v14 = vadd.f32 %v331_v59, %v288_v12  ;;  %v351_v15 = vadd.f32 %v350_v41, %v288_v12 }
 0x157   :  { %v360_v20 = vmax.f32 %v332_v14, 0.0  ;;  %v361_v21 = vmax.f32 %v351_v15, 0.0 }
 0x15c   :  { %v333_v60 = vpop.f32.mrf.mxu0  ;;  %v352_v61 = vpop.f32.mrf.mxu1 }
 0x15d   :  { %v334_v51 = vadd.f32 %v333_v60, %v293_v1  ;;  %v353_v13 = vadd.f32 %v352_v61, %v293_v1  ;;  %v742_v60 = vld [vmem:[%s1023_s3 + $0x20] sm:$0xff]  ;;  %v743_v61 = vld [vmem:[%s1023_s3 + $0x28] sm:$0xff]  ;;  %v491_v1 = vpop.permute.xlu1 %490 }
 0x15f   :  { %v362_v16 = vmax.f32 %v334_v51, 0.0  ;;  %v363_v17 = vmax.f32 %v353_v13, 0.0 }
 0x161   :  { %v368_v22 = vpack.c.bf16 %v362_v16, %v360_v20  ;;  %v369_v23 = vpack.c.bf16 %v363_v17, %v361_v21 }
 0x164   :  { %v336_v37 = vpop.f32.mrf.mxu0  ;;  %v355_v63 = vpop.f32.mrf.mxu1 }
 0x165   :  { %v337_v4 = vadd.f32 %v336_v37, %v298_v62  ;;  %v356_v55 = vadd.f32 %v355_v63, %v298_v62 }
 0x167   :  { %v364_v42 = vmax.f32 %v337_v4, 0.0  ;;  %v365_v2 = vmax.f32 %v356_v55, 0.0 }
 0x16c   :  { %v338_v5 = vpop.f32.mrf.mxu0  ;;  %v357_v11 = vpop.f32.mrf.mxu1 }
 0x16d   :  { %v339_v38 = vadd.f32 %v338_v5, %v303_v0  ;;  %v358_v52 = vadd.f32 %v357_v11, %v303_v0  ;;  %v496_v5 = vpop.permute.xlu2 %495  ;;  %v486_v11 = vpop.permute.xlu1 %485 }
 0x16f   :  { %v366_v45 = vmax.f32 %v339_v38, 0.0  ;;  %v367_v3 = vmax.f32 %v358_v52, 0.0  ;;  %v481_v52 = vpop.permute.xlu0 %480 }
 0x171   :  { %v370_v18 = vpack.c.bf16 %v366_v45, %v364_v42  ;;  %v371_v19 = vpack.c.bf16 %v367_v3, %v365_v2 }
 0x173   :  { %424 = vmatpush.bf16.msra.mxu2 %v370_v18  ;;  %443 = vmatpush.bf16.msra.mxu3 %v371_v19 }
 0x177   :  { %425 = vmatpush.bf16.msra.mxu2 %v368_v22  ;;  %444 = vmatpush.bf16.msra.mxu3 %v369_v23 }
 0x17a   :  { %710 = vmatmul.msk.bf16.vlgmr.msra.gmra.mxu2 %vm315_vm0, %v740_v24  ;;  %712 = vmatmul.msk.bf16.vlgmr.msra.gmra.mxu3 %vm315_vm0, %v740_v24 }
 0x18a   :  { %711 = vmatmul.msk.bf16.gmra.mxu2 %vm315_vm0, %v741_v6  ;;  %713 = vmatmul.msk.bf16.gmra.mxu3 %vm315_vm0, %v741_v6 }
 0x1fd   :  { %v427_v25 = vpop.f32.mrf.mxu2  ;;  %v446_v26 = vpop.f32.mrf.mxu3 }
 0x1fe   :  { %v428_v46 = vadd.f32 %v427_v25, %v385_v35  ;;  %v447_v47 = vadd.f32 %v446_v26, %v385_v35 }
 0x200   :  { %v456_v39 = vmax.f32 %v428_v46, 0.0  ;;  %v457_v58 = vmax.f32 %v447_v47, 0.0 }
 0x205   :  { %v429_v7 = vpop.f32.mrf.mxu2  ;;  %v448_v8 = vpop.f32.mrf.mxu3 }
 0x206   :  { %v430_v33 = vadd.f32 %v429_v7, %v390_v30  ;;  %v449_v36 = vadd.f32 %v448_v8, %v390_v30  ;;  %v564_v7 = vld [vmem:[%s1024_s5] sm:$0x3]  ;;  %v569_v8 = vpop.permute.xlu2 %568 }
 0x208   :  { %v458_v53 = vmax.f32 %v430_v33, 0.0  ;;  %v459_v54 = vmax.f32 %v449_v36, 0.0 }
 0x20a   :  { %v464_v59 = vpack.c.bf16 %v458_v53, %v456_v39  ;;  %v465_v41 = vpack.c.bf16 %v459_v54, %v457_v58 }
 0x20d   :  { %v432_v28 = vpop.f32.mrf.mxu2  ;;  %v451_v29 = vpop.f32.mrf.mxu3 }
 0x20e   :  { %v433_v32 = vadd.f32 %v432_v28, %v395_v27  ;;  %v452_v43 = vadd.f32 %v451_v29, %v395_v27 }
 0x210   :  { %v460_v48 = vmax.f32 %v433_v32, 0.0  ;;  %v461_v49 = vmax.f32 %v452_v43, 0.0 }
 0x215   :  { %v434_v44 = vpop.f32.mrf.mxu2  ;;  %v453_v31 = vpop.f32.mrf.mxu3 }
 0x216   :  { %v435_v9 = vadd.f32 %v434_v44, %v400_v40  ;;  %v454_v10 = vadd.f32 %v453_v31, %v400_v40 }
 0x218   :  { %v462_v50 = vmax.f32 %v435_v9, 0.0  ;;  %v463_v34 = vmax.f32 %v454_v10, 0.0 }
 0x21a   :  { %v466_v56 = vpack.c.bf16 %v462_v50, %v460_v48  ;;  %v467_v57 = vpack.c.bf16 %v463_v34, %v461_v49  ;;  %v600_v49 = vlaneseq }
 0x21c   :  { %520 = vmatpush.bf16.msrb.mxu0 %v466_v56  ;;  %539 = vmatpush.bf16.msrb.mxu1 %v467_v57  ;;  %v601_v53 = vshrl.u32 %v600_v49, 7 }
 0x21e   :  { %vm668_vm1 = vcmp.lt.s32.totalorder %v601_v53, 3 }
 0x220   :  { %521 = vmatpush.bf16.msrb.mxu0 %v464_v59  ;;  %540 = vmatpush.bf16.msrb.mxu1 %v465_v41 }
 0x223   :  { %730 = vmatmul.msk.bf16.vlgmr.msrb.gmra.mxu0 %vm315_vm0, %v742_v60  ;;  %732 = vmatmul.msk.bf16.vlgmr.msrb.gmra.mxu1 %vm315_vm0, %v742_v60 }
 0x233   :  { %731 = vmatmul.msk.bf16.gmra.mxu0 %vm315_vm0, %v743_v61  ;;  %733 = vmatmul.msk.bf16.gmra.mxu1 %vm315_vm0, %v743_v61 }
 0x2a0   :  { %v523_v62 = vpop.f32.mrf.mxu0  ;;  %v542_v37 = vpop.f32.mrf.mxu1 }
 0x2a1   :  { %v524_v45 = vadd.f32 %v523_v62, %v481_v52  ;;  %v543_v3 = vadd.f32 %v542_v37, %v481_v52 }
 0x2a3   :  { %v552_v24 = vmax.f32 %v524_v45, 0.0  ;;  %v553_v6 = vmax.f32 %v543_v3, 0.0 }
 0x2a8   :  { %v525_v63 = vpop.f32.mrf.mxu0  ;;  %v544_v0 = vpop.f32.mrf.mxu1 }
 0x2a9   :  { %v526_v14 = vadd.f32 %v525_v63, %v486_v11  ;;  %v545_v15 = vadd.f32 %v544_v0, %v486_v11 }
 0x2ab   :  { %v554_v20 = vmax.f32 %v526_v14, 0.0  ;;  %v555_v21 = vmax.f32 %v545_v15, 0.0 }
 0x2ad   :  { %v560_v25 = vpack.c.bf16 %v554_v20, %v552_v24  ;;  %v561_v26 = vpack.c.bf16 %v555_v21, %v553_v6 }
 0x2b0   :  { %v528_v4 = vpop.f32.mrf.mxu0  ;;  %v547_v55 = vpop.f32.mrf.mxu1 }
 0x2b1   :  { %v529_v12 = vadd.f32 %v528_v4, %v491_v1  ;;  %v548_v51 = vadd.f32 %v547_v55, %v491_v1 }
 0x2b3   :  { %v556_v16 = vmax.f32 %v529_v12, 0.0  ;;  %v557_v17 = vmax.f32 %v548_v51, 0.0 }
 0x2b8   :  { %v530_v13 = vpop.f32.mrf.mxu0  ;;  %v549_v38 = vpop.f32.mrf.mxu1 }
 0x2b9   :  { %v531_v42 = vadd.f32 %v530_v13, %v496_v5  ;;  %v550_v2 = vadd.f32 %v549_v38, %v496_v5 }
 0x2bb   :  { %v558_v18 = vmax.f32 %v531_v42, 0.0  ;;  %v559_v19 = vmax.f32 %v550_v2, 0.0 }
 0x2bd   :  { %v562_v22 = vpack.c.bf16 %v558_v18, %v556_v16  ;;  %v563_v23 = vpack.c.bf16 %v559_v19, %v557_v17 }
 0x2bf   :  { %580 = vmatpush.bf16.msrb.mxu2 %v562_v22  ;;  %593 = vmatpush.bf16.msrb.mxu3 %v563_v23 }
 0x2c3   :  { %581 = vmatpush.bf16.msrb.mxu2 %v560_v25  ;;  %594 = vmatpush.bf16.msrb.mxu3 %v561_v26 }
 0x2c6   :  { %734 = vmatmul.msk.bf16.vlgmr.msrb.gmra.mxu2 %vm315_vm0, %v564_v7  ;;  %735 = vmatmul.msk.bf16.vlgmr.msrb.gmra.mxu3 %vm315_vm0, %v564_v7 }
 0x349   :  { %v583_v27 = vpop.f32.mrf.mxu2  ;;  %v596_v28 = vpop.f32.mrf.mxu3 }
 0x34a   :  { %v998_v29 = vadd.f32 %v583_v27, %v569_v8  ;;  %v1000_v30 = vadd.f32 %v596_v28, %v569_v8 }
 0x34c   :  { %v736_v40 = vmul.f32 -1.442695, %v998_v29  ;;  %v642_v32 = vmin.f32 %v998_v29, 8.0  ;;  %v737_v43 = vmul.f32 -1.442695, %v1000_v30  ;;  %v643_v44 = vmin.f32 %v1000_v30, 8.0 }
 0x34d   :  { %vm641_vm2 = vcmp.gt.f32.partialorder %v1000_v30, 8.0  ;;  %vm640_vm13 = vcmp.gt.f32.partialorder %v998_v29, 8.0 }
 0x34e   :  { %772 = vpow2.f32 %v736_v40  ;;  %v644_v31 = vmul.f32 1.442695, %v642_v32  ;;  %v646_v35 = vmul.f32 1.442695, %v643_v44 }
 0x34f   :  { %774 = vpow2.f32 %v737_v43 }
 0x350   :  { %776 = vpow2.f32 %v644_v31 }
 0x351   :  { %v598_v33 = vpop.f32.mrf.mxu3  ;;  %v585_v36 = vpop.f32.mrf.mxu2  ;;  %778 = vpow2.f32 %v646_v35 }
 0x354   :  { %v773_v9 = vpop.eup %772 }
 0x355   :  { %v775_v10 = vpop.eup %774  ;;  %v608_v46 = vadd.f32 1.0, %v773_v9 }
 0x356   :  { %v777_v47 = vpop.eup %776  ;;  %v609_v48 = vadd.f32 1.0, %v775_v10 }
 0x357   :  { %780 = vrcp.f32 %v608_v46  ;;  %v779_v50 = vpop.eup %778  ;;  %v648_v34 = vadd.f32 1.0, %v777_v47  ;;  %v651_v39 = vmul.f32 -0.5, %v777_v47  ;;  %vm615_vm3 = vweird.f32 %v608_v46 }
 0x358   :  { %782 = vrcp.f32 %v609_v48  ;;  %v657_v54 = vadd.f32 1.0, %v779_v50  ;;  %v660_v56 = vmul.f32 -0.5, %v779_v50  ;;  %v621_v62 = vand.u32 2147483648, %v608_v46 }
 0x359   :  { %784 = vlog2.f32 %v648_v34  ;;  %v619_v63 = vand.u32 2147483647, %v608_v46  ;;  %v652_v0 = vadd.f32 1.0, %v651_v39  ;;  %v663_v4 = vand.u32 2147483647, %v779_v50 }
 0x35a   :  { %786 = vlog2.f32 %v657_v54  ;;  %v661_v37 = vadd.f32 1.0, %v660_v56  ;;  %v654_v5 = vand.u32 2147483647, %v777_v47  ;;  %v636_v11 = vand.u32 2147483648, %v609_v48 }
 0x35b   :  { %v634_v38 = vand.u32 2147483647, %v609_v48  ;;  %v622_v14 = vor.u32 1.1754944e-38, %v621_v62  ;;  %v653_v2 = vmul.f32 %v777_v47, %v652_v0  ;;  %vm630_vm7 = vweird.f32 %v609_v48 }
 0x35c   :  { %v662_v42 = vmul.f32 %v779_v50, %v661_v37  ;;  %vm664_vm8 = vcmp.lt.f32.partialorder %v663_v4, 0.0004427343  ;;  %vm655_vm9 = vcmp.lt.f32.partialorder %v654_v5, 0.0004427343  ;;  %v637_v16 = vor.u32 1.1754944e-38, %v636_v11 }
 0x35d   :  { %v781_v57 = vpop.eup %780  ;;  %vm620_vm11 = vcmp.eq.f32.partialorder %v619_v63, 8.507059e+37  ;;  %vm635_vm12 = vcmp.eq.f32.partialorder %v634_v38, 8.507059e+37 }
 0x35e   :  { %v783_v58 = vpop.eup %782  ;;  %v611_v59 = vmul.f32 %v781_v57, %v608_v46  ;;  %vm616_vm4 = vweird.f32 %v781_v57 }
 0x35f   :  { %v626_v41 = vmul.f32 %v783_v58, %v609_v48  ;;  %v785_v60 = vpop.eup %784  ;;  %vm631_vm5 = vweird.f32 %v783_v58  ;;  %vm617_vm6 = vmor %vm615_vm3, %vm616_vm4 }
 0x360   :  { %v612_v61 = vsub.f32 1.0, %v611_v59  ;;  %v787_v12 = vpop.eup %786  ;;  %v650_v51 = vmul.f32 0.6931472, %v785_v60  ;;  %vm632_vm10 = vmor %vm630_vm7, %vm631_vm5 }
 0x361   :  { %v627_v1 = vsub.f32 1.0, %v626_v41  ;;  %v659_v15 = vmul.f32 0.6931472, %v787_v12 }
 0x362   :  { %v613_v55 = vmul.f32 %v781_v57, %v612_v61  ;;  %v656_v18 = vsel %vm655_vm9, %v653_v2, %v650_v51 }
 0x363   :  { %v628_v13 = vmul.f32 %v783_v58, %v627_v1  ;;  %v665_v17 = vsel %vm664_vm8, %v662_v42, %v659_v15  ;;  %v666_v24 = vsel %vm640_vm13, %v998_v29, %v656_v18 }
 0x364   :  { %v614_v52 = vadd.f32 %v781_v57, %v613_v55  ;;  %v667_v22 = vsel %vm641_vm2, %v1000_v30, %v665_v17 }
 0x365   :  { %v629_v45 = vadd.f32 %v783_v58, %v628_v13 }
 0x366   :  { %v618_v3 = vsel %vm617_vm6, %v781_v57, %v614_v52 }
 0x367   :  { %v633_v19 = vsel %vm632_vm10, %v783_v58, %v629_v45  ;;  %v623_v20 = vsel %vm620_vm11, %v622_v14, %v618_v3 }
 0x368   :  { %v638_v21 = vsel %vm635_vm12, %v637_v16, %v633_v19  ;;  %v669_v25 = vsel %vm668_vm1, %v623_v20, %v666_v24 }
 0x369   :  { %v670_v23 = vsel %vm668_vm1, %v638_v21, %v667_v22 }
 0x36a   :  { %v673_v6 = vrot.slane %v670_v23, 4 }
 0x36c   :  { %v675_v26 = vsel %vm674_vm14, %v669_v25, %v673_v6 }
 0x36d   :  { %677 = vst [vmem:[%s1025_s7] sm:$0xff] %v675_v26 }

</bundles_post_ra>
